<compile_context>
chip_gen: v7x
topology: tpu7x:2x2x1
jax: 0.10.0
libtpu: 0.0.40
codegen_flags: <defaults>
</compile_context>

<pallas_src>
import functools

import jax
import jax.numpy as jnp
from jax import lax
from jax.experimental import pallas as pl
from jax.experimental.pallas import tpu as pltpu

_EPS = 1e-8
_MIB = 1024 * 1024


def _pick_tile(total, candidate, step):
    """Largest multiple of `step` <= candidate (>= step); prefer a divisor of
    `total` (not shrinking below candidate//2) so the last tile needs no mask."""
    candidate = max(step, (candidate // step) * step)
    if candidate >= total:
        return total                      # full extent: always a legal block dim
    lo = max(step, candidate // 2)
    t = candidate
    while t >= lo:
        if total % t == 0:
            return t
        t -= step
    return candidate


def _select_tiles(rows, cols, itemsize):
    """VMEM-budget-aware tile selection (2 inputs x 2 pipeline buffers)."""
    packing = max(1, 4 // itemsize)       # f32 -> 1, bf16 -> 2, int8/fp8 -> 4
    sublane = 8 * packing                 # dtype-aware sublane floor

    try:
        vmem_cap = int(pltpu.get_tpu_info().vmem_capacity_bytes)
    except Exception:
        vmem_cap = 64 * _MIB              # conservative fallback (v7x-sized)
    vmem_limit = min(vmem_cap // 2, 64 * _MIB)   # v7x: 32 MiB; v5e/v6e: 64 MiB
    input_budget = (vmem_limit * 3) // 4         # headroom for output + scratch
    tile_budget = min(8 * _MIB, input_budget // 4)  # per input tile, 2x2 buffered

    row_bytes = cols * itemsize
    if sublane * row_bytes <= tile_budget:
        # Rows narrow enough: stream full rows, tile only the row axis.
        tile_cols = cols
        max_rows = (tile_budget // row_bytes) // sublane * sublane
        tile_rows = _pick_tile(rows, max(max_rows, sublane), sublane)
    else:
        # Very wide rows (large H*W): tile the reduction axis too so the
        # per-step footprint stays bounded regardless of H*W (critical on
        # v7x's 64 MiB VMEM).
        tile_rows = _pick_tile(rows, min(rows, 256), sublane)
        max_cols = (tile_budget // max(tile_rows * itemsize, 1)) // 128 * 128
        if max_cols >= cols:
            tile_cols = cols
        else:
            tile_cols = _pick_tile(cols, max(max_cols, 128), 128)

    return tile_rows, tile_cols, vmem_limit


def _partials_kernel(x_ref, y_ref, out_ref, *acc_refs, rows, cols,
                     tile_rows, tile_cols, row_mask, col_mask):
    i = pl.program_id(0)

    x = x_ref[...].astype(jnp.float32)    # (tile_rows, tile_cols), cast in-kernel
    y = y_ref[...].astype(jnp.float32)

    if col_mask:
        # Zero the padded columns of the final (partial) column tile.
        j = pl.program_id(1)
        col_ids = j * tile_cols + lax.broadcasted_iota(jnp.int32, (1, tile_cols), 1)
        cvalid = col_ids < cols
        x = jnp.where(cvalid, x, 0.0)
        y = jnp.where(cvalid, y, 0.0)

    d = x - y
    dd = jnp.sum(d * d, axis=1, keepdims=True)   # per-row SSE, no cancellation
    xx = jnp.sum(x * x, axis=1, keepdims=True)
    yy = jnp.sum(y * y, axis=1, keepdims=True)
    xy = jnp.sum(x * y, axis=1, keepdims=True)

    def finalize(s_dd, s_xx, s_yy, s_xy):
        # Cosine finalize with one EUP rsqrt:
        #   dot / max(||x||*||y||, eps) == dot * rsqrt(max(xx*yy, eps^2))
        cos = s_xy * lax.rsqrt(jnp.maximum(s_xx * s_yy, jnp.float32(_EPS * _EPS)))
        one_minus_cos = 1.0 - cos
        sse = s_dd
        if row_mask:
            # Zero the padded rows of the final (partial) row tile.
            row_ids = i * tile_rows + lax.broadcasted_iota(
                jnp.int32, (tile_rows, 1), 0)
            rvalid = row_ids < rows
            one_minus_cos = jnp.where(rvalid, one_minus_cos, 0.0)
            sse = jnp.where(rvalid, sse, 0.0)
        # Two unmasked lane-dense (8, 128) stores; no concatenated temporary.
        out_ref[:, :, 0:128] = jnp.broadcast_to(jnp.sum(sse), (1, 8, 128))
        out_ref[:, :, 128:256] = jnp.broadcast_to(jnp.sum(one_minus_cos), (1, 8, 128))

    if acc_refs:
        # Column-tiled path: accumulate per-row sums across column tiles and
        # finalize (cosine + partial store) on the last column step only.
        acc_dd, acc_xx, acc_yy, acc_xy = acc_refs
        j = pl.program_id(1)

        @pl.when(j == 0)
        def _():
            acc_dd[...] = dd
            acc_xx[...] = xx
            acc_yy[...] = yy
            acc_xy[...] = xy

        @pl.when(j != 0)
        def _():
            acc_dd[...] += dd
            acc_xx[...] += xx
            acc_yy[...] += yy
            acc_xy[...] += xy

        @pl.when(j == pl.num_programs(1) - 1)
        def _():
            finalize(acc_dd[...], acc_xx[...], acc_yy[...], acc_xy[...])
    else:
        finalize(dd, xx, yy, xy)


def _loss_stats(pred, target, tile_rows=None, tile_cols=None):
    """Returns (mse, mean(1 - cosine_similarity_per_row)) for NCHW pred/target."""
    n, c, h, w = pred.shape
    rows, cols = n * c, h * w

    # Stream inputs in their native dtype; cast to f32 inside the kernel.
    x = pred.reshape(rows, cols)
    y = target.reshape(rows, cols)

    itemsize = jnp.dtype(x.dtype).itemsize
    auto_rows, auto_cols, vmem_limit = _select_tiles(rows, cols, itemsize)
    if tile_rows is None:
        tile_rows = auto_rows
    if tile_cols is None:
        tile_cols = auto_cols

    num_row_tiles = pl.cdiv(rows, tile_rows)
    num_col_tiles = pl.cdiv(cols, tile_cols)
    row_mask = (rows % tile_rows) != 0
    col_mask = (cols % tile_cols) != 0

    kernel = functools.partial(
        _partials_kernel, rows=rows, cols=cols,
        tile_rows=tile_rows, tile_cols=tile_cols,
        row_mask=row_mask, col_mask=col_mask)

    # Per-row accumulators only needed when the reduction axis is tiled.
    if num_col_tiles > 1:
        scratch_shapes = [pltpu.VMEM((tile_rows, 1), jnp.float32)] * 4
    else:
        scratch_shapes = []

    partials = pl.pallas_call(
        kernel,
        out_shape=jax.ShapeDtypeStruct((num_row_tiles, 8, 256), jnp.float32),
        grid_spec=pltpu.PrefetchScalarGridSpec(
            num_scalar_prefetch=0,
            grid=(num_row_tiles, num_col_tiles),
            in_specs=[
                pl.BlockSpec((tile_rows, tile_cols), lambda i, j: (i, j)),
                pl.BlockSpec((tile_rows, tile_cols), lambda i, j: (i, j)),
            ],
            out_specs=pl.BlockSpec((1, 8, 256), lambda i, j: (i, 0, 0)),
            scratch_shapes=scratch_shapes,
        ),
        compiler_params=pltpu.CompilerParams(
            # Row tiles are independent -> "parallel" (multi-TC sharding on
            # v7x); the column axis carries the accumulators -> "arbitrary".
            dimension_semantics=("parallel", "arbitrary"),
            vmem_limit_bytes=vmem_limit,
        ),
    )(x, y)

    sse = jnp.sum(partials[:, 0, 0])
    cos_sum = jnp.sum(partials[:, 0, 128])
    mse = sse / jnp.float32(rows * cols)
    cossim = cos_sum / jnp.float32(rows)
    return mse, cossim


def adaptive_mse_cos_loss(pred, target, linear_weight, tile_rows=None, tile_cols=None):
    """linear_weight: (2, 1) parameter of nn.Linear(1, 2, bias=False)."""
    mse, cossim = _loss_stats(pred, target, tile_rows=tile_rows, tile_cols=tile_cols)
    # Tiny scalar weight math (nn.Linear(1,2) applied to ones(1,1)) kept in plain JAX.
    one = jnp.ones((1, 1), jnp.float32)
    weight = one @ linear_weight.astype(jnp.float32).T  # (1, 2)
    loss = (
        jnp.exp(-weight[0, 0]) * mse
        + jnp.exp(-weight[0, 1]) * cossim
        + jnp.sum(weight)
    )
    return loss


def _reference_loss(pred, target, linear_weight):
    n, c, h, w = pred.shape
    x = pred.reshape(-1, h * w).astype(jnp.float32)
    y = target.reshape(-1, h * w).astype(jnp.float32)
    mse = jnp.mean((x - y) ** 2)
    dot = jnp.sum(x * y, axis=1)
    cos = dot / jnp.maximum(
        jnp.linalg.norm(x, axis=1) * jnp.linalg.norm(y, axis=1), _EPS
    )
    cossim = jnp.mean(1.0 - cos)
    weight = jnp.ones((1, 1), jnp.float32) @ linear_weight.astype(jnp.float32).T
    return (
        jnp.exp(-weight[0, 0]) * mse
        + jnp.exp(-weight[0, 1]) * cossim
        + jnp.sum(weight)
    )


if __name__ == "__main__":
    # nn.Linear(1, 2, bias=False) with nn.init.constant_(weight, 1).
    linear_weight = jnp.ones((2, 1), dtype=jnp.float32)

    # 1) Small NCHW shape matching the module's forward; auto tiling (one block).
    k1, k2 = jax.random.split(jax.random.PRNGKey(0))
    pred = jax.random.normal(k1, (2, 4, 16, 16), dtype=jnp.float32)
    target = jax.random.normal(k2, (2, 4, 16, 16), dtype=jnp.float32)
    loss = jax.block_until_ready(adaptive_mse_cos_loss(pred, target, linear_weight))
    ref = jax.block_until_ready(_reference_loss(pred, target, linear_weight))
    assert jnp.allclose(loss, ref, rtol=1e-5, atol=1e-5), (loss, ref)

    # 2) Multi row-tile + column-tile (accumulator) path, evenly divisible.
    k3, k4 = jax.random.split(jax.random.PRNGKey(1))
    pred2 = jax.random.normal(k3, (4, 16, 16, 16), dtype=jnp.float32)   # rows=64, cols=256
    target2 = jax.random.normal(k4, (4, 16, 16, 16), dtype=jnp.float32)
    loss2 = jax.block_until_ready(
        adaptive_mse_cos_loss(pred2, target2, linear_weight, tile_rows=32, tile_cols=128)
    )
    ref2 = jax.block_until_ready(_reference_loss(pred2, target2, linear_weight))
    assert jnp.allclose(loss2, ref2, rtol=1e-5, atol=1e-5), (loss2, ref2)

    # 3) Padded final row tile AND padded final column tile: exercises both masks.
    k5, k6 = jax.random.split(jax.random.PRNGKey(2))
    pred3 = jax.random.normal(k5, (5, 8, 16, 18), dtype=jnp.float32)    # rows=40, cols=288
    target3 = jax.random.normal(k6, (5, 8, 16, 18), dtype=jnp.float32)
    loss3 = jax.block_until_ready(
        adaptive_mse_cos_loss(pred3, target3, linear_weight, tile_rows=32, tile_cols=128)
    )
    ref3 = jax.block_until_ready(_reference_loss(pred3, target3, linear_weight))
    assert jnp.allclose(loss3, ref3, rtol=1e-5, atol=1e-5), (loss3, ref3)

    print("KERNEL_OK")
</pallas_src>

<mosaic_0001>
module attributes {stable_mosaic.version = 11 : i64} {
  func.func @_partials_kernel(%arg0: i32, %arg1: i32, %arg2: memref<8x256xf32, #tpu.memory_space<vmem>>, %arg3: memref<8x256xf32, #tpu.memory_space<vmem>>, %arg4: memref<1x8x256xf32, #tpu.memory_space<vmem>>) attributes {dimension_semantics = [#tpu.dimension_semantics<parallel>, #tpu.dimension_semantics<arbitrary>], iteration_bounds = array<i64: 1, 1>, scalar_prefetch = 0 : i64, scratch_operands = 0 : i64, tpu.core_type = #tpu.core_type<tc>, window_params = [{transform_indices = @transform_0, window_bounds = array<i64: 8, 256>}, {transform_indices = @transform_1, window_bounds = array<i64: 8, 256>}, {transform_indices = @transform_2, window_bounds = array<i64: 1, 8, 256>}]} {
    %c0 = arith.constant 0 : index
    %c0_0 = arith.constant 0 : index
    %0 = vector.load %arg2[%c0, %c0_0] : memref<8x256xf32, #tpu.memory_space<vmem>>, vector<8x256xf32>
    %c0_1 = arith.constant 0 : index
    %c0_2 = arith.constant 0 : index
    %1 = vector.load %arg3[%c0_1, %c0_2] : memref<8x256xf32, #tpu.memory_space<vmem>>, vector<8x256xf32>
    %2 = arith.subf %0, %1 : vector<8x256xf32>
    %3 = arith.mulf %2, %2 : vector<8x256xf32>
    %cst = arith.constant dense<0.000000e+00> : vector<8xf32>
    %4 = vector.multi_reduction <add>, %3, %cst [1] : vector<8x256xf32> to vector<8xf32>
    %5 = vector.shape_cast %4 : vector<8xf32> to vector<8x1xf32>
    %6 = arith.mulf %0, %0 : vector<8x256xf32>
    %cst_3 = arith.constant dense<0.000000e+00> : vector<8xf32>
    %7 = vector.multi_reduction <add>, %6, %cst_3 [1] : vector<8x256xf32> to vector<8xf32>
    %8 = vector.shape_cast %7 : vector<8xf32> to vector<8x1xf32>
    %9 = arith.mulf %1, %1 : vector<8x256xf32>
    %cst_4 = arith.constant dense<0.000000e+00> : vector<8xf32>
    %10 = vector.multi_reduction <add>, %9, %cst_4 [1] : vector<8x256xf32> to vector<8xf32>
    %11 = vector.shape_cast %10 : vector<8xf32> to vector<8x1xf32>
    %12 = arith.mulf %0, %1 : vector<8x256xf32>
    %cst_5 = arith.constant dense<0.000000e+00> : vector<8xf32>
    %13 = vector.multi_reduction <add>, %12, %cst_5 [1] : vector<8x256xf32> to vector<8xf32>
    %14 = vector.shape_cast %13 : vector<8xf32> to vector<8x1xf32>
    %15 = arith.mulf %8, %11 : vector<8x1xf32>
    %cst_6 = arith.constant 1.000000e-16 : f32
    %16 = vector.broadcast %cst_6 : f32 to vector<8x1xf32>
    %17 = arith.maximumf %15, %16 : vector<8x1xf32>
    %18 = math.rsqrt %17 : vector<8x1xf32>
    %19 = arith.mulf %14, %18 : vector<8x1xf32>
    %cst_7 = arith.constant 1.000000e+00 : f32
    %20 = vector.broadcast %cst_7 : f32 to vector<8x1xf32>
    %21 = arith.subf %20, %19 : vector<8x1xf32>
    %22 = vector.shape_cast %5 : vector<8x1xf32> to vector<1x8x1xf32>
    %cst_8 = arith.constant dense<0.000000e+00> : vector<1xf32>
    %23 = vector.multi_reduction <add>, %22, %cst_8 [1, 2] : vector<1x8x1xf32> to vector<1xf32>
    %24 = vector.shape_cast %23 : vector<1xf32> to vector<1x1x1xf32>
    %25 = vector.extract %24[0, 0, 0] : f32 from vector<1x1x1xf32>
    %26 = vector.broadcast %25 : f32 to vector<1x8x128xf32>
    %c0_9 = arith.constant 0 : index
    %c0_10 = arith.constant 0 : index
    %c0_11 = arith.constant 0 : index
    %27 = vector.load %arg4[%c0_9, %c0_10, %c0_11] : memref<1x8x256xf32, #tpu.memory_space<vmem>>, vector<1x8x128xf32>
    tpu.vector_store %arg4[%c0_9, %c0_10, %c0_11], %26 {strides = array<i32>} : memref<1x8x256xf32, #tpu.memory_space<vmem>>, vector<1x8x128xf32>,
    %28 = vector.shape_cast %21 : vector<8x1xf32> to vector<1x8x1xf32>
    %cst_12 = arith.constant dense<0.000000e+00> : vector<1xf32>
    %29 = vector.multi_reduction <add>, %28, %cst_12 [1, 2] : vector<1x8x1xf32> to vector<1xf32>
    %30 = vector.shape_cast %29 : vector<1xf32> to vector<1x1x1xf32>
    %31 = vector.extract %30[0, 0, 0] : f32 from vector<1x1x1xf32>
    %32 = vector.broadcast %31 : f32 to vector<1x8x128xf32>
    %c0_13 = arith.constant 0 : index
    %c0_14 = arith.constant 0 : index
    %c128 = arith.constant 128 : index
    %33 = vector.load %arg4[%c0_13, %c0_14, %c128] : memref<1x8x256xf32, #tpu.memory_space<vmem>>, vector<1x8x128xf32>
    tpu.vector_store %arg4[%c0_13, %c0_14, %c128], %32 {strides = array<i32>} : memref<1x8x256xf32, #tpu.memory_space<vmem>>, vector<1x8x128xf32>,
    return
  }
  func.func @transform_0(%arg0: i32, %arg1: i32) -> (i32, i32) {
    %c0_i32 = arith.constant 0 : i32
    return %arg0, %arg1 : i32, i32
  }
  func.func @transform_1(%arg0: i32, %arg1: i32) -> (i32, i32) {
    %c0_i32 = arith.constant 0 : i32
    return %arg0, %arg1 : i32, i32
  }
  func.func @transform_2(%arg0: i32, %arg1: i32) -> (i32, i32, i32) {
    %c0_i32 = arith.constant 0 : i32
    %c0_i32_0 = arith.constant 0 : i32
    %c0_i32_1 = arith.constant 0 : i32
    return %arg0, %c0_i32, %c0_i32_0 : i32, i32, i32
  }
}

</mosaic_0001>

<bundles_post_ra>
// kernel: tpu_custom_call.1
= control target key start
LH: loop header
LB: loop body
LE: loop exit
PB: predicated region body
PF: predicated region fallthrough
CT: control target
= control target key end

     0   :  { %7 = vsyncpa [#allocation3], 0  ;;  %s243_s0 = inlined_call_operand.hbm [shape: f32[8,256], index: 0, kind: input, shape index: {}]   ;;  %s244_s1 = inlined_call_operand.hbm [shape: f32[8,256], index: 1, kind: input, shape index: {}]   ;;  %s245_s2 = inlined_call_operand.hbm [shape: f32[1,8,256], index: 2, kind: output, shape index: {}]  }
   0x1   :  { %8 = vsyncpa [#allocation6], 0 }
   0x2   :  { %9 = vsyncpa [#allocation4], 0  ;;  %s189_s9 = smov [#allocation2]   ;;  %s190_s11 = smov [#allocation5]  }
   0x3   :  { %s16_s10 = sshll.u32 %s189_s9, 4  ;;  %s26_s12 = sshll.u32 %s190_s11, 4  ;;  %s17_s10 = int_to_ptr.vmem [resolvable:$true] %s16_s10  ;;  %s27_s12 = int_to_ptr.vmem [resolvable:$true] %s26_s12 }
   0x4   :  { %s117_s15 = scalar_lea.hbm %s243_s0, 256 }
   0x5   :  { %p118_p0 = scmp.ne.s32.totalorder %s243_s0, %s117_s15  ;;  %p121_p1 = scmp.lt.u32.totalorder %s117_s15, %s243_s0 }
   0x7   :  { %p123_p2 = pnand %p121_p1, %p118_p0 }
   0x9   :  { %126 = shalt.err (!%p123_p2)
}
   0xa   :  { %s127_s20 = scalar_lea.vmem %s17_s10, 256  ;;  %p132_p4 = scmp.lt.s32.totalorder %s17_s10, %s17_s10 }
   0xb   :  { %p128_p3 = scmp.ne.s32.totalorder %s17_s10, %s127_s20  ;;  %p133_p5 = scmp.lt.s32.totalorder %s127_s20, %s127_s20 }
   0xd   :  { %p134_p6 = por %p133_p5, %p132_p4 }
   0xf   :  { %p135_p7 = pnand %p134_p6, %p128_p3 }
  0x11   :  { %138 = shalt.err (!%p135_p7)
}
  0x12   :  { %19 = dma.hbm_to_vmem [thread:$0]  %s243_s0, 256, %s17_s10, [#allocation3]  }
  0x13   :  { %s139_s25 = scalar_lea.hbm %s244_s1, 256 }
  0x14   :  { %p140_p8 = scmp.ne.s32.totalorder %s244_s1, %s139_s25  ;;  %p143_p9 = scmp.lt.u32.totalorder %s139_s25, %s244_s1 }
  0x16   :  { %p145_p10 = pnand %p143_p9, %p140_p8 }
  0x18   :  { %148 = shalt.err (!%p145_p10)
}
  0x19   :  { %s149_s30 = scalar_lea.vmem %s27_s12, 256  ;;  %p154_p12 = scmp.lt.s32.totalorder %s27_s12, %s27_s12 }
  0x1a   :  { %p150_p11 = scmp.ne.s32.totalorder %s27_s12, %s149_s30  ;;  %p155_p13 = scmp.lt.s32.totalorder %s149_s30, %s149_s30 }
  0x1c   :  { %p156_p0 = por %p155_p13, %p154_p12 }
  0x1e   :  { %p157_p1 = pnand %p156_p0, %p150_p11 }
  0x20   :  { %160 = shalt.err (!%p157_p1)
}
  0x21   :  { %29 = dma.hbm_to_vmem [thread:$0]  %s244_s1, 256, %s27_s12, [#allocation6]  }
  0x22   :  { %183 = dma.done.wait [#allocation3], 256  }
  0x23   :  { %184 = vsyncadd [#allocation3], 4294967040 }
  0x24   :  { %185 = dma.done.wait [#allocation6], 256  }
  0x25   :  { %186 = vsyncadd [#allocation6], 4294967040  ;;  %v36_v0 = vld [vmem:[#allocation2] sm:$0xff]  ;;  %v37_v1 = vld [vmem:[#allocation2 + $0x8] sm:$0xff]  ;;  %vm67_vm0 = vcmask 7168   ;;  %s191_s4 = smov [#allocation7]  }
  0x26   :  { %v38_v2 = vld [vmem:[#allocation5] sm:$0xff]  ;;  %v47_v3 = vmul.f32 %v36_v0, %v36_v0  ;;  %v48_v4 = vmul.f32 %v37_v1, %v37_v1  ;;  %v39_v5 = vld [vmem:[#allocation5 + $0x8] sm:$0xff]  ;;  %s98_s5 = sshll.u32 %s191_s4, 4  ;;  %s99_s5 = int_to_ptr.vmem [resolvable:$true] %s98_s5 }
  0x27   :  { %v52_v6 = vmul.f32 %v38_v2, %v38_v2  ;;  %v57_v7 = vmul.f32 %v38_v2, %v36_v0  ;;  %v53_v8 = vmul.f32 %v39_v5, %v39_v5  ;;  %v58_v9 = vmul.f32 %v39_v5, %v37_v1  ;;  %s161_s7 = scalar_lea.vmem %s99_s5, 256  ;;  %p166_p3 = scmp.lt.s32.totalorder %s99_s5, %s99_s5 }
  0x28   :  { %v40_v10 = vsub.f32 %v36_v0, %v38_v2  ;;  %v41_v11 = vsub.f32 %v37_v1, %v39_v5  ;;  %v49_v12 = vadd.f32 %v48_v4, %v47_v3  ;;  %p162_p2 = scmp.ne.s32.totalorder %s99_s5, %s161_s7  ;;  %p167_p4 = scmp.lt.s32.totalorder %s161_s7, %s161_s7 }
  0x29   :  { %v59_v13 = vadd.f32 %v58_v9, %v57_v7  ;;  %v54_v16 = vadd.f32 %v53_v8, %v52_v6 }
  0x2a   :  { %v42_v14 = vmul.f32 %v40_v10, %v40_v10  ;;  %v43_v15 = vmul.f32 %v41_v11, %v41_v11  ;;  %50 = vadd.xlane.f32.xlu0 %v49_v12  ;;  %p168_p5 = por %p167_p4, %p166_p3 }
  0x2b   :  { %60 = vadd.xlane.f32.xlu1 %v59_v13 }
  0x2c   :  { %v44_v17 = vadd.f32 %v43_v15, %v42_v14  ;;  %p169_p6 = pnand %p168_p5, %p162_p2 }
  0x2e   :  { %55 = vadd.xlane.f32.xlu0 %v54_v16 }
  0x2f   :  { %45 = vadd.xlane.f32.xlu1 %v44_v17 }
  0xb7   :  { %v51_v18 = vpop.xlane.xlu0 %50 }
  0xb8   :  { %v61_v19 = vpop.xlane.xlu1 %60 }
  0xbb   :  { %v56_v20 = vpop.xlane.xlu0 %55 }
  0xbc   :  { %v62_v21 = vmul.f32 %v56_v20, %v51_v18  ;;  %v46_v22 = vpop.xlane.xlu1 %45 }
  0xbd   :  { %v68_v23 = vsel %vm67_vm0, %v46_v22, 0.0 }
  0xbe   :  { %v63_v24 = vmax.f32 %v62_v21, 1e-16  ;;  %69 = vadd.xlane.f32.xlu0 %v68_v23 }
  0xc0   :  { %115 = vrsqrt.f32 %v63_v24 }
  0xca   :  { %v116_v25 = vpop.eup %115 }
  0xcb   :  { %v65_v26 = vmul.f32 %v116_v25, %v61_v19 }
  0xcd   :  { %v66_v27 = vsub.f32 1.0, %v65_v26 }
  0xcf   :  { %v80_v28 = vsel %vm67_vm0, %v66_v27, 0.0 }
  0xd0   :  { %81 = vadd.xlane.f32.xlu1 %v80_v28 }
 0x14b   :  { %v70_v29 = vpop.xlane.xlu0 %69 }
 0x14c   :  { %v71_v30 = vrot.slane %v70_v29, 4 }
 0x14e   :  { %v72_v31 = vadd.f32 %v71_v30, %v70_v29 }
 0x150   :  { %v73_v32 = vrot.slane %v72_v31, 2 }
 0x152   :  { %v74_v33 = vadd.f32 %v73_v32, %v72_v31 }
 0x154   :  { %v75_v34 = vrot.slane %v74_v33, 1 }
 0x156   :  { %v76_v35 = vadd.f32 %v75_v34, %v74_v33 }
 0x158   :  { %108 = vpush %v76_v35 }
 0x15d   :  { %v82_v36 = vpop.xlane.xlu1 %81 }
 0x15e   :  { %v83_v37 = vrot.slane %v82_v36, 4 }
 0x160   :  { %v84_v38 = vadd.f32 %v83_v37, %v82_v36 }
 0x162   :  { %v85_v39 = vrot.slane %v84_v38, 2 }
 0x164   :  { %v86_v40 = vadd.f32 %v85_v39, %v84_v38 }
 0x166   :  { %v87_v41 = vrot.slane %v86_v40, 1 }
 0x168   :  { %v88_v42 = vadd.f32 %v87_v41, %v86_v40 }
 0x16a   :  { %110 = vpush %v88_v42 }
 0x189   :  { %s109_s1 = spop %108 }
 0x18a   :  { %v78_v43 = vstv %s109_s1 }
 0x18b   :  { %79 = vst [vmem:[#allocation7] sm:$0xff] %v78_v43 }
 0x19b   :  { %s111_s6 = spop %110 }
 0x19c   :  { %v90_v44 = vstv %s111_s6 }
 0x19d   :  { %91 = vst [vmem:[#allocation7 + $0x8] sm:$0xff] %v90_v44 }
 0x19e   :  { %172 = shalt.err (!%p169_p6)
}
 0x19f   :  { %s173_s10 = scalar_lea.hbm %s245_s2, 256 }
 0x1a0   :  { %p174_p7 = scmp.ne.s32.totalorder %s245_s2, %s173_s10  ;;  %p177_p8 = scmp.lt.u32.totalorder %s173_s10, %s245_s2 }
 0x1a2   :  { %p179_p9 = pnand %p177_p8, %p174_p7 }
 0x1a4   :  { %182 = shalt.err (!%p179_p9)
}
 0x1a5   :  { %101 = dma.vmem_to_hbm [thread:$0]  %s99_s5, 256, %s245_s2, [#allocation4]  }
 0x1a6   :  { %187 = dma.done.wait [#allocation4], 256  }
 0x1a7   :  { %188 = vsyncadd [#allocation4], 4294967040 }
 0x1a8   :  { %105 = vsyncpa [#allocation3], 1 }
 0x1a9   :  { %106 = vsyncpa [#allocation6], 1 }
 0x1aa   :  { %107 = vsyncpa [#allocation4], 1 }

</bundles_post_ra>
